<compile_context>
chip_gen: v6e
topology: v6e:2x2x1
jax: 0.10.0
libtpu: 0.0.40
codegen_flags: <defaults>
</compile_context>

<pallas_src>
import jax
import jax.numpy as jnp
import numpy as np
from jax.experimental import pallas as pl
from jax.experimental.pallas import tpu as pltpu


def _matmul_bn_relu_kernel(x_ref, w_ref, ss_ref, o_ref):
    """One fused step: (tm, 2K) @ (2K, 2C) -> BN affine -> ReLU -> store.

    x_ref  : (tm, 2K)   packed im2col rows (two output pixels per row)
    w_ref  : (2K, 2C)   block-diagonal 3x3-conv weights
    ss_ref : (2, 2C)    row 0 = fused BN scale, row 1 = fused BN shift (+ conv bias)
    o_ref  : (tm, 2C)   packed outputs (lane-dense: 2C is a multiple of 128)
    """
    acc = jnp.dot(x_ref[...], w_ref[...], preferred_element_type=jnp.float32)
    y = acc * ss_ref[0:1, :] + ss_ref[1:2, :]   # eval-mode BN (+ folded conv bias)
    # Dropout(p=0.1): eval-mode identity (no-op at inference).
    o_ref[...] = jnp.maximum(y, 0.0).astype(o_ref.dtype)


def _round_up(a, b):
    return ((a + b - 1) // b) * b


def vcnet4_block_forward(x_nchw, params, eps=1e-5,
                         compute_dtype=jnp.bfloat16, tm=128):
    """Forward of VCNet4Block (pixel-level sensing path). Input/output are NCHW."""
    B, Cin, H, W = x_nchw.shape
    Cout = params["conv_w"].shape[-1]
    K = 9 * Cin
    M = B * H * W
    assert M % 2 == 0, "B*H*W must be even for two-pixel lane packing"
    Mp = M // 2                      # two output pixels per packed row

    # --- im2col in the wrapper (XLA fuses it with the transpose / pad / cast) ---
    x = jnp.transpose(x_nchw, (0, 2, 3, 1))                     # NCHW -> NHWC
    xpad = jnp.pad(x, ((0, 0), (1, 1), (1, 1), (0, 0)))         # pad=1 for 3x3
    cols = [xpad[:, dy:dy + H, dx:dx + W, :]
            for dy in range(3) for dx in range(3)]               # tap-major
    x_col = jnp.concatenate(cols, axis=-1)                       # (B, H, W, 9*Cin)
    x_packed = x_col.reshape(Mp, 2 * K).astype(compute_dtype)    # (Mp, 2K)

    # --- robust row tiling: pad packed rows to a multiple of tm (>= 8 sublanes) ---
    tm = min(tm, _round_up(Mp, 8))
    Mp_pad = _round_up(Mp, tm)
    if Mp_pad != Mp:
        x_packed = jnp.pad(x_packed, ((0, Mp_pad - Mp), (0, 0)))
    grid = (Mp_pad // tm,)

    # --- block-diagonal weights: row r @ w_big = [pix(2r) @ W | pix(2r+1) @ W] ---
    w_flat = params["conv_w"].reshape(K, Cout)                   # HWIO -> (9*Cin, Cout)
    zero = jnp.zeros_like(w_flat)
    w_big = jnp.concatenate(
        [jnp.concatenate([w_flat, zero], axis=1),
         jnp.concatenate([zero, w_flat], axis=1)], axis=0
    ).astype(compute_dtype)                                      # (2K, 2*Cout)

    # --- eval-mode BatchNorm fused with conv bias: y = acc*scale + shift ---
    scale = params["bn_gamma"] / jnp.sqrt(params["bn_running_var"] + eps)
    shift = (params["bn_beta"] - params["bn_running_mean"] * scale
             + params["conv_b"] * scale)
    ss = jnp.stack([jnp.tile(scale, 2),
                    jnp.tile(shift, 2)]).astype(jnp.float32)     # (2, 2*Cout)

    itemsize = jnp.dtype(compute_dtype).itemsize
    cost = pl.CostEstimate(
        flops=2 * Mp_pad * (2 * K) * (2 * Cout),
        transcendentals=0,
        bytes_accessed=(Mp_pad * 2 * K * itemsize          # packed im2col activations
                        + 2 * K * 2 * Cout * itemsize      # block-diagonal weights
                        + 2 * 2 * Cout * 4                 # scale/shift
                        + Mp_pad * 2 * Cout * 4),          # output
    )

    out_packed = pl.pallas_call(
        _matmul_bn_relu_kernel,
        out_shape=jax.ShapeDtypeStruct((Mp_pad, 2 * Cout), x_nchw.dtype),
        grid_spec=pltpu.PrefetchScalarGridSpec(
            num_scalar_prefetch=0,
            grid=grid,
            in_specs=[
                pl.BlockSpec((tm, 2 * K), lambda i: (i, 0)),
                pl.BlockSpec((2 * K, 2 * Cout), lambda i: (0, 0)),
                pl.BlockSpec((2, 2 * Cout), lambda i: (0, 0)),
            ],
            out_specs=pl.BlockSpec((tm, 2 * Cout), lambda i: (i, 0)),
        ),
        compiler_params=pltpu.CompilerParams(
            dimension_semantics=("parallel",)),
        cost_estimate=cost,
    )(x_packed, w_big, ss)

    out_packed = out_packed[:Mp]                       # drop row padding (if any)
    out_nhwc = out_packed.reshape(B, H, W, Cout)       # free row-major unpack
    return jnp.transpose(out_nhwc, (0, 3, 1, 2))       # NHWC -> NCHW


def _reference(x_nchw, params, eps=1e-5):
    """Pure-JAX reference of the same forward, for correctness checking."""
    x = jnp.transpose(x_nchw, (0, 2, 3, 1))
    y = jax.lax.conv_general_dilated(
        x, params["conv_w"], window_strides=(1, 1), padding="SAME",
        dimension_numbers=("NHWC", "HWIO", "NHWC"),
        precision=jax.lax.Precision.HIGHEST,
    )
    y = y + params["conv_b"]
    scale = params["bn_gamma"] / jnp.sqrt(params["bn_running_var"] + eps)
    shift = params["bn_beta"] - params["bn_running_mean"] * scale
    y = jnp.maximum(y * scale + shift, 0.0)
    return jnp.transpose(y, (0, 3, 1, 2))


def init_params(key, dest_channels, feat_channels):
    k = jax.random.split(key, 6)
    fan_in = dest_channels * 9
    return {
        # OvConv4 stand-in: single 3x3 conv dest_channels -> feat_channels (HWIO)
        "conv_w": jax.random.normal(
            k[0], (3, 3, dest_channels, feat_channels), jnp.float32
        ) / np.sqrt(fan_in),
        "conv_b": 0.1 * jax.random.normal(k[1], (feat_channels,), jnp.float32),
        # BatchNorm2d(feat_channels) parameters / running statistics
        "bn_gamma": 1.0 + 0.1 * jax.random.normal(k[2], (feat_channels,), jnp.float32),
        "bn_beta": 0.1 * jax.random.normal(k[3], (feat_channels,), jnp.float32),
        "bn_running_mean": 0.1 * jax.random.normal(k[4], (feat_channels,), jnp.float32),
        "bn_running_var": 1.0 + 0.1 * jax.random.uniform(k[5], (feat_channels,), jnp.float32),
    }


if __name__ == "__main__":
    # Small shapes consistent with the module constructor:
    # dest_channels=8, feat_channels=64, width=height=16, batch=2.
    B, DEST_C, FEAT_C, H, W = 2, 8, 64, 16, 16

    key = jax.random.PRNGKey(0)
    kx, kp = jax.random.split(key)
    x = jax.random.normal(kx, (B, DEST_C, H, W), jnp.float32)   # NCHW, like PyTorch
    params = init_params(kp, DEST_C, FEAT_C)

    ref = jax.block_until_ready(_reference(x, params))

    # Exact-f32 path: tight tolerance (accumulation-order differences only).
    out_f32 = jax.block_until_ready(
        vcnet4_block_forward(x, params, compute_dtype=jnp.float32))
    assert out_f32.shape == (B, FEAT_C, H, W), out_f32.shape
    np.testing.assert_allclose(np.asarray(out_f32), np.asarray(ref),
                               rtol=1e-4, atol=1e-4)

    # Default bf16-MXU path (v6e/v7x recommendation): bf16 operand rounding only,
    # f32 accumulation + epilogue -> loose tolerance.
    out = jax.block_until_ready(vcnet4_block_forward(x, params))
    assert out.shape == (B, FEAT_C, H, W), out.shape
    np.testing.assert_allclose(np.asarray(out), np.asarray(ref),
                               rtol=3e-2, atol=3e-2)

    print("KERNEL_OK")
</pallas_src>

<mosaic_0001>
module attributes {stable_mosaic.version = 11 : i64} {
  func.func @_matmul_bn_relu_kernel(%arg0: i32, %arg1: memref<128x144xf32, #tpu.memory_space<vmem>>, %arg2: memref<144x128xf32, #tpu.memory_space<vmem>>, %arg3: memref<2x128xf32, #tpu.memory_space<vmem>>, %arg4: memref<128x128xf32, #tpu.memory_space<vmem>>) attributes {dimension_semantics = [#tpu.dimension_semantics<parallel>], iteration_bounds = array<i64: 2>, scalar_prefetch = 0 : i64, scratch_operands = 0 : i64, tpu.core_type = #tpu.core_type<tc>, window_params = [{transform_indices = @transform_0, window_bounds = array<i64: 128, 144>}, {pipeline_mode = #tpu.pipeline_mode<synchronous>, transform_indices = @transform_1, window_bounds = array<i64: 144, 128>}, {pipeline_mode = #tpu.pipeline_mode<synchronous>, transform_indices = @transform_2, window_bounds = array<i64: 2, 128>}, {transform_indices = @transform_3, window_bounds = array<i64: 128, 128>}]} {
    %c0 = arith.constant 0 : index
    %c0_0 = arith.constant 0 : index
    %0 = vector.load %arg1[%c0, %c0_0] : memref<128x144xf32, #tpu.memory_space<vmem>>, vector<128x144xf32>
    %c0_1 = arith.constant 0 : index
    %c0_2 = arith.constant 0 : index
    %1 = vector.load %arg2[%c0_1, %c0_2] : memref<144x128xf32, #tpu.memory_space<vmem>>, vector<144x128xf32>
    %cst = arith.constant dense<0.000000e+00> : vector<128x128xf32>
    %2 = tpu.matmul %0, %1, %cst {dimension_numbers = #tpu.dot_dimension_numbers<[1], [0], [0], [1], [0, 0, 1, 1], [], []>} : vector<128x144xf32>, vector<144x128xf32>, vector<128x128xf32> -> vector<128x128xf32>
    %c0_3 = arith.constant 0 : index
    %c0_4 = arith.constant 0 : index
    %3 = vector.load %arg3[%c0_3, %c0_4] : memref<2x128xf32, #tpu.memory_space<vmem>>, vector<1x128xf32>
    %4 = vector.broadcast %3 : vector<1x128xf32> to vector<128x128xf32>
    %5 = arith.mulf %2, %4 : vector<128x128xf32>
    %c1 = arith.constant 1 : index
    %c0_5 = arith.constant 0 : index
    %6 = vector.load %arg3[%c1, %c0_5] : memref<2x128xf32, #tpu.memory_space<vmem>>, vector<1x128xf32>
    %7 = vector.broadcast %6 : vector<1x128xf32> to vector<128x128xf32>
    %8 = arith.addf %5, %7 : vector<128x128xf32>
    %cst_6 = arith.constant 0.000000e+00 : f32
    %9 = vector.broadcast %cst_6 : f32 to vector<128x128xf32>
    %10 = arith.maximumf %8, %9 : vector<128x128xf32>
    %c0_7 = arith.constant 0 : index
    %c0_8 = arith.constant 0 : index
    %11 = vector.load %arg4[%c0_7, %c0_8] : memref<128x128xf32, #tpu.memory_space<vmem>>, vector<128x128xf32>
    tpu.vector_store %arg4[%c0_7, %c0_8], %10 {strides = array<i32>} : memref<128x128xf32, #tpu.memory_space<vmem>>, vector<128x128xf32>,
    return
  }
  func.func @transform_0(%arg0: i32) -> (i32, i32) {
    %c0_i32 = arith.constant 0 : i32
    %c0_i32_0 = arith.constant 0 : i32
    return %arg0, %c0_i32 : i32, i32
  }
  func.func @transform_1(%arg0: i32) -> (i32, i32) {
    %c0_i32 = arith.constant 0 : i32
    %c0_i32_0 = arith.constant 0 : i32
    %c0_i32_1 = arith.constant 0 : i32
    return %c0_i32, %c0_i32_0 : i32, i32
  }
  func.func @transform_2(%arg0: i32) -> (i32, i32) {
    %c0_i32 = arith.constant 0 : i32
    %c0_i32_0 = arith.constant 0 : i32
    %c0_i32_1 = arith.constant 0 : i32
    return %c0_i32, %c0_i32_0 : i32, i32
  }
  func.func @transform_3(%arg0: i32) -> (i32, i32) {
    %c0_i32 = arith.constant 0 : i32
    %c0_i32_0 = arith.constant 0 : i32
    return %arg0, %c0_i32 : i32, i32
  }
}

</mosaic_0001>

<bundles_post_ra>
// kernel: tpu_custom_call.1
= control target key start
LH: loop header
LB: loop body
LE: loop exit
PB: predicated region body
PF: predicated region fallthrough
CT: control target
= control target key end

     0   :  { %8 = vsyncpa [#allocation3], 0  ;;  %s1072_s0 = inlined_call_operand.vmem [shape: f32[256,144], index: 0, kind: input, shape index: {}]   ;;  %s1073_s1 = inlined_call_operand.vmem [shape: f32[144,128], index: 1, kind: input, shape index: {}]   ;;  %s1074_s2 = inlined_call_operand.vmem [shape: f32[2,128], index: 2, kind: input, shape index: {}]   ;;  %s1075_s3 = inlined_call_operand.hbm [shape: f32[256,128], index: 3, kind: output, shape index: {}]  }
   0x1   :  { %10 = vsyncpa [#allocation3 + $0x1], 0  ;;  %s766_s12 = smov 0   ;;  %s768_s13 = smov 0  }
   0x2   :  { %s770_s14 = smov 0   ;;  %s772_s15 = smov 0  }
   0x3 LB: > { %s787_s16 = sadd.s32 4294967295, %s740_s15   ;;  %s569_s17 = sadd.s32 4294967294, %s740_s15   ;;  %s740_s15 = sphi %s772_s15, %s1081_s15   ;;  %s736_s14 = sphi %s770_s14, %s1080_s14   ;;  %s732_s13 = sphi %s768_s13, %s1079_s13   ;;  %s728_s12 = sphi %s766_s12, %s1078_s12  }
   0x4   : > { %s791_s18 = sadd.s32 1, %s740_s15   ;;  %s91_s19 = sadd.s32 1, %s736_s14 }
   0x5   : > { %s88_s20 = ssub.s32 %s740_s15, %s791_s18  ;;  %p101_p0 = scmp.ne.s32.totalorder %s736_s14, %s732_s13 }
   0x6   : > { %p89_p1 = scmp.eq.s32.totalorder %s88_s20, 0  ;;  %p102_p2 = scmp.eq.s32.totalorder %s787_s16, 1 }
   0x7   : > { %p107_p3 = scmp.ne.s32.totalorder %s732_s13, %s728_s12  ;;  %p108_p4 = scmp.eq.s32.totalorder %s569_s17, 1 }
   0x8   : > { %s802_s21 = scalar_select %p89_p1, %s736_s14, %s91_s19  }
   0x9   : > { %p804_p5 = por %p102_p2, %p101_p0  ;;  %p808_p6 = por %p108_p4, %p107_p3 }
   0xa   : > { %p572_p7 = scmp.ge.s32.totalorder %s740_s15, 1  ;;  %p142_p8 = scmp.lt.s32.totalorder %s740_s15, 3 }
   0xc   : > { %p143_p9 = pnand %p572_p7, %p142_p8 }
   0xd   : > { %s574_s26 = sshll.u32 (!%p143_p9), %s787_s16, 4  ;;  %s164_s29 = sand.u32 (!%p143_p9), 1, %s732_s13  }
   0xe   : > { %146 = sbr.rel (%p143_p9) target bundleno = 298 (0x12a), region = 32  ;;  %p168_p10 = scmp.lt.s32.totalorder (!%p143_p9), %s574_s26, 31 }
   0xf   : > { %s573_s7 = sshll.u32 (!%p143_p9), %s164_s29, 7  ;;  %s601_s9 = sshll.u32 (!%p143_p9), %s787_s16, 11 }
  0x10   : > { %s977_s8 = scalar_lea.vmem (!%p143_p9), [#allocation2], %s573_s7  ;;  %s1024_s19 = scalar_lea.hbm (!%p143_p9), %s1075_s3, %s601_s9 }
  0x11   : > { %s1032_s16 = scalar_lea.sflag (!%p143_p9), [#allocation3], %s164_s29  ;;  %s743_s24 = smov (!%p143_p9), [#allocation2]  }
  0x12   : > { %s684_s25 = sshll.u32 (!%p143_p9), %s743_s24, 4  ;;  %s685_s25 = int_to_ptr.vmem [resolvable:$false] %s684_s25 }
  0x13   : > { %v222_v0 = vld [vmem:[%s1073_s1 + $0x78] sm:$0xff]  ;;  %v742_v1 = vmov 0.0   ;;  %v221_v2 = vld [vmem:[%s1073_s1 + $0x70] sm:$0xff]  ;;  %v220_v3 = vld [vmem:[%s1073_s1 + $0x68] sm:$0xff]  ;;  %s1083_s26 = smov (!%p168_p10, %s574_s26), 31  ;;  %vm225_vm0 = vcmask 130048  }
  0x14   : > { %274 = vmatprep.subr.mxu0 %v742_v1  ;;  %602 = vmatprep.subr.mxu1 %v742_v1  ;;  %v219_v4 = vld [vmem:[%s1073_s1 + $0x60] sm:$0xff]  ;;  %v218_v5 = vld [vmem:[%s1073_s1 + $0x58] sm:$0xff]  ;;  %v217_v6 = vld [vmem:[%s1073_s1 + $0x50] sm:$0xff]  ;;  %s600_s10 = sshll.u32 %s1083_s26, 4 }
  0x15   : > { %275 = vmatpush1.msra.mxu0 %v222_v0  ;;  %620 = vmatpush1.msra.mxu1 %v222_v0  ;;  %v216_v7 = vld [vmem:[%s1073_s1 + $0x48] sm:$0xff]  ;;  %v215_v8 = vld [vmem:[%s1073_s1 + $0x40] sm:$0xff]  ;;  %v214_v9 = vld [vmem:[%s1073_s1 + $0x38] sm:$0xff]  ;;  %s901_s26 = scalar_lea.vmem %s1072_s0, %s600_s10  ;;  %s507_s10 = sshll.u32 %s977_s8, 4  ;;  %s1026_s10 = int_to_ptr.vmem [resolvable:$true] %s507_s10 }
  0x16   : > { %276 = vmatprep.subr.mxu0 %v742_v1  ;;  %603 = vmatprep.subr.mxu1 %v742_v1  ;;  %v213_v10 = vld [vmem:[%s1073_s1 + $0x30] sm:$0xff]  ;;  %v212_v11 = vld [vmem:[%s1073_s1 + $0x28] sm:$0xff]  ;;  %v211_v12 = vld [vmem:[%s1073_s1 + $0x20] sm:$0xff]  ;;  %s680_s20 = scalar_lea.vmem %s1026_s10, 2048  ;;  %p687_p0 = scmp.lt.s32.totalorder %s1026_s10, %s685_s25 }
  0x17   : > { %277 = vmatpush1.msra.mxu0 %v221_v2  ;;  %621 = vmatpush1.msra.mxu1 %v221_v2  ;;  %v210_v13 = vld [vmem:[%s1073_s1 + $0x18] sm:$0xff]  ;;  %v209_v14 = vld [vmem:[%s1073_s1 + $0x10] sm:$0xff]  ;;  %v208_v15 = vld [vmem:[%s1073_s1 + $0x8] sm:$0xff]  ;;  %p681_p11 = scmp.ne.s32.totalorder %s1026_s10, %s680_s20 }
  0x18   : > { %278 = vmatprep.subr.mxu0 %v742_v1  ;;  %604 = vmatprep.subr.mxu1 %v742_v1  ;;  %v207_v16 = vld [vmem:[%s1073_s1] sm:$0xff]  ;;  %v224_v17 = vld [vmem:[%s1073_s1 + $0x88] sm:$0xff]  ;;  %v178_v23 = vld [vmem:[%s901_s26 + $0x18] sm:$0xff] }
  0x19   : > { %279 = vmatpush1.msra.mxu0 %v220_v3  ;;  %622 = vmatpush1.msra.mxu1 %v220_v3  ;;  %v223_v18 = vld [vmem:[%s1073_s1 + $0x80] sm:$0xff]  ;;  %v176_v19 = vld [vmem:[%s901_s26 + $0x8] sm:$0xff]  ;;  %v194_v24 = vld [vmem:[%s901_s26 + $0x98] sm:$0xff]  ;;  %p682_p12 = pnand %p681_p11, %p804_p5 }
  0x1a   : > { %280 = vmatprep.subr.mxu0 %v742_v1  ;;  %605 = vmatprep.subr.mxu1 %v742_v1  ;;  %v192_v20 = vld [vmem:[%s901_s26 + $0x88] sm:$0xff]  ;;  %v175_v21 = vld [vmem:[%s901_s26] sm:$0xff]  ;;  %v177_v25 = vld [vmem:[%s901_s26 + $0x10] sm:$0xff] }
  0x1b   : > { %281 = vmatpush1.msra.mxu0 %v219_v4  ;;  %623 = vmatpush1.msra.mxu1 %v219_v4  ;;  %v191_v22 = vld [vmem:[%s901_s26 + $0x80] sm:$0xff]  ;;  %v193_v26 = vld [vmem:[%s901_s26 + $0x90] sm:$0xff]  ;;  %v180_v27 = vld [vmem:[%s901_s26 + $0x28] sm:$0xff]  ;;  %p683_p13 = pneg %p682_p12 }
  0x1c   : > { %282 = vmatprep.subr.mxu0 %v742_v1  ;;  %606 = vmatprep.subr.mxu1 %v742_v1  ;;  %v196_v28 = vld [vmem:[%s901_s26 + $0xa8] sm:$0xff]  ;;  %v179_v29 = vld [vmem:[%s901_s26 + $0x20] sm:$0xff]  ;;  %v182_v31 = vld [vmem:[%s901_s26 + $0x38] sm:$0xff] }
  0x1d   : > { %283 = vmatpush1.msra.mxu0 %v218_v5  ;;  %624 = vmatpush1.msra.mxu1 %v218_v5  ;;  %v195_v30 = vld [vmem:[%s901_s26 + $0xa0] sm:$0xff]  ;;  %v198_v32 = vld [vmem:[%s901_s26 + $0xb8] sm:$0xff]  ;;  %v181_v33 = vld [vmem:[%s901_s26 + $0x30] sm:$0xff] }
  0x1e   : > { %284 = vmatprep.subr.mxu0 %v742_v1  ;;  %607 = vmatprep.subr.mxu1 %v742_v1  ;;  %v197_v34 = vld [vmem:[%s901_s26 + $0xb0] sm:$0xff]  ;;  %v184_v35 = vld [vmem:[%s901_s26 + $0x48] sm:$0xff]  ;;  %v183_v37 = vld [vmem:[%s901_s26 + $0x40] sm:$0xff] }
  0x1f   : > { %285 = vmatpush1.msra.mxu0 %v217_v6  ;;  %625 = vmatpush1.msra.mxu1 %v217_v6  ;;  %v200_v36 = vld [vmem:[%s901_s26 + $0xc8] sm:$0xff]  ;;  %v199_v38 = vld [vmem:[%s901_s26 + $0xc0] sm:$0xff]  ;;  %v186_v39 = vld [vmem:[%s901_s26 + $0x58] sm:$0xff] }
  0x20   : > { %286 = vmatprep.subr.mxu0 %v742_v1  ;;  %608 = vmatprep.subr.mxu1 %v742_v1  ;;  %v202_v40 = vld [vmem:[%s901_s26 + $0xd8] sm:$0xff]  ;;  %v185_v41 = vld [vmem:[%s901_s26 + $0x50] sm:$0xff]  ;;  %v188_v43 = vld [vmem:[%s901_s26 + $0x68] sm:$0xff] }
  0x21   : > { %287 = vmatpush1.msra.mxu0 %v216_v7  ;;  %626 = vmatpush1.msra.mxu1 %v216_v7  ;;  %v201_v42 = vld [vmem:[%s901_s26 + $0xd0] sm:$0xff]  ;;  %v204_v44 = vld [vmem:[%s901_s26 + $0xe8] sm:$0xff]  ;;  %v187_v45 = vld [vmem:[%s901_s26 + $0x60] sm:$0xff] }
  0x22   : > { %288 = vmatprep.subr.mxu0 %v742_v1  ;;  %609 = vmatprep.subr.mxu1 %v742_v1  ;;  %v203_v46 = vld [vmem:[%s901_s26 + $0xe0] sm:$0xff]  ;;  %v190_v47 = vld [vmem:[%s901_s26 + $0x78] sm:$0xff]  ;;  %v189_v49 = vld [vmem:[%s901_s26 + $0x70] sm:$0xff] }
  0x23   : > { %289 = vmatpush1.msra.mxu0 %v215_v8  ;;  %627 = vmatpush1.msra.mxu1 %v215_v8  ;;  %v206_v48 = vld [vmem:[%s901_s26 + $0xf8] sm:$0xff]  ;;  %v205_v50 = vld [vmem:[%s901_s26 + $0xf0] sm:$0xff]  ;;  %v962_v51 = vld [vmem:[%s1074_s2] ss:$0 sm:$0xff]  ;;  %s686_s26 = scalar_lea.vmem %s685_s25, 4096 }
  0x24   : > { %290 = vmatprep.subr.mxu0 %v742_v1  ;;  %610 = vmatprep.subr.mxu1 %v742_v1  ;;  %v967_v53 = vld [vmem:[%s1074_s2 + $0x1] ss:$0 sm:$0xff]  ;;  %p688_p1 = scmp.lt.s32.totalorder %s686_s26, %s680_s20 }
  0x25   : > { %291 = vmatpush1.msra.mxu0 %v214_v9  ;;  %628 = vmatpush1.msra.mxu1 %v214_v9 }
  0x26   : > { %292 = vmatprep.subr.mxu0 %v742_v1  ;;  %611 = vmatprep.subr.mxu1 %v742_v1  ;;  %p689_p2 = por %p688_p1, %p687_p0 }
  0x27   : > { %293 = vmatpush1.msra.mxu0 %v213_v10  ;;  %629 = vmatpush1.msra.mxu1 %v213_v10 }
  0x28   : > { %294 = vmatprep.subr.mxu0 %v742_v1  ;;  %612 = vmatprep.subr.mxu1 %v742_v1  ;;  %p690_p3 = pnand %p689_p2, %p683_p13 }
  0x29   : > { %295 = vmatpush1.msra.mxu0 %v212_v11  ;;  %630 = vmatpush1.msra.mxu1 %v212_v11 }
  0x2a   : > { %296 = vmatprep.subr.mxu0 %v742_v1  ;;  %613 = vmatprep.subr.mxu1 %v742_v1 }
  0x2b   : > { %297 = vmatpush1.msra.mxu0 %v211_v12  ;;  %631 = vmatpush1.msra.mxu1 %v211_v12 }
  0x2c   : > { %298 = vmatprep.subr.mxu0 %v742_v1  ;;  %614 = vmatprep.subr.mxu1 %v742_v1 }
  0x2d   : > { %299 = vmatpush1.msra.mxu0 %v210_v13  ;;  %632 = vmatpush1.msra.mxu1 %v210_v13 }
  0x2e   : > { %300 = vmatprep.subr.mxu0 %v742_v1  ;;  %615 = vmatprep.subr.mxu1 %v742_v1 }
  0x2f   : > { %301 = vmatpush1.msra.mxu0 %v209_v14  ;;  %633 = vmatpush1.msra.mxu1 %v209_v14 }
  0x30   : > { %302 = vmatprep.subr.mxu0 %v742_v1  ;;  %616 = vmatprep.subr.mxu1 %v742_v1 }
  0x31   : > { %303 = vmatpush1.msra.mxu0 %v208_v15  ;;  %634 = vmatpush1.msra.mxu1 %v208_v15 }
  0x32   : > { %304 = vmatprep.subr.mxu0 %v742_v1  ;;  %617 = vmatprep.subr.mxu1 %v742_v1 }
  0x33   : > { %305 = vmatpush1.msra.mxu0 %v207_v16  ;;  %635 = vmatpush1.msra.mxu1 %v207_v16 }
  0x34   : > { %334 = vmatprep.subr.mxu0 %v742_v1  ;;  %618 = vmatprep.subr.mxu1 %v742_v1 }
  0x35   : > { %335 = vmatpush2.msra.mxu0 %v224_v17  ;;  %636 = vmatpush2.msra.mxu1 %v224_v17 }
  0x36   : > { %336 = vmatprep.subr.mxu0 %v742_v1  ;;  %619 = vmatprep.subr.mxu1 %v742_v1 }
  0x37   : > { %337 = vmatpush2.msra.mxu0 %v223_v18  ;;  %637 = vmatpush2.msra.mxu1 %v223_v18 }
  0x38   : > { %577 = vmatprep.mubr.msk.f32.mxu0 %vm225_vm0, %v176_v19  ;;  %585 = vmatprep.mubr.msk.f32.mxu1 %vm225_vm0, %v192_v20 }
  0x39   : > { %339 = vmatmul.mubr.f32.vlgmr.msra.gmra.mxu0 %v175_v21  ;;  %379 = vmatmul.mubr.f32.vlgmr.msra.gmra.mxu1 %v191_v22 }
  0x3a   : > { %578 = vmatprep.mubr.msk.f32.mxu0 %vm225_vm0, %v178_v23  ;;  %586 = vmatprep.mubr.msk.f32.mxu1 %vm225_vm0, %v194_v24 }
  0x3d   : > { %344 = vmatmul.mubr.f32.gmra.mxu0 %v177_v25  ;;  %384 = vmatmul.mubr.f32.gmra.mxu1 %v193_v26 }
  0x3e   : > { %579 = vmatprep.mubr.msk.f32.mxu0 %vm225_vm0, %v180_v27  ;;  %587 = vmatprep.mubr.msk.f32.mxu1 %vm225_vm0, %v196_v28 }
  0x41   : > { %349 = vmatmul.mubr.f32.gmra.mxu0 %v179_v29  ;;  %389 = vmatmul.mubr.f32.gmra.mxu1 %v195_v30 }
  0x42   : > { %580 = vmatprep.mubr.msk.f32.mxu0 %vm225_vm0, %v182_v31  ;;  %588 = vmatprep.mubr.msk.f32.mxu1 %vm225_vm0, %v198_v32 }
  0x45   : > { %354 = vmatmul.mubr.f32.gmra.mxu0 %v181_v33  ;;  %394 = vmatmul.mubr.f32.gmra.mxu1 %v197_v34 }
  0x46   : > { %581 = vmatprep.mubr.msk.f32.mxu0 %vm225_vm0, %v184_v35  ;;  %589 = vmatprep.mubr.msk.f32.mxu1 %vm225_vm0, %v200_v36 }
  0x49   : > { %359 = vmatmul.mubr.f32.gmra.mxu0 %v183_v37  ;;  %399 = vmatmul.mubr.f32.gmra.mxu1 %v199_v38 }
  0x4a   : > { %582 = vmatprep.mubr.msk.f32.mxu0 %vm225_vm0, %v186_v39  ;;  %590 = vmatprep.mubr.msk.f32.mxu1 %vm225_vm0, %v202_v40 }
  0x4d   : > { %364 = vmatmul.mubr.f32.gmra.mxu0 %v185_v41  ;;  %404 = vmatmul.mubr.f32.gmra.mxu1 %v201_v42 }
  0x4e   : > { %583 = vmatprep.mubr.msk.f32.mxu0 %vm225_vm0, %v188_v43  ;;  %591 = vmatprep.mubr.msk.f32.mxu1 %vm225_vm0, %v204_v44 }
  0x51   : > { %369 = vmatmul.mubr.f32.gmra.mxu0 %v187_v45  ;;  %409 = vmatmul.mubr.f32.gmra.mxu1 %v203_v46 }
  0x52   : > { %584 = vmatprep.mubr.msk.f32.mxu0 %vm225_vm0, %v190_v47  ;;  %592 = vmatprep.mubr.msk.f32.mxu1 %vm225_vm0, %v206_v48 }
  0x55   : > { %374 = vmatmul.mubr.f32.gmra.mxu0 %v189_v49  ;;  %414 = vmatmul.mubr.f32.gmra.mxu1 %v205_v50 }
  0xf9   : > { %v340_v52 = vpop.f32.mrf.mxu0  ;;  %v380_v54 = vpop.f32.mrf.mxu1 }
  0xfa   : > { %v424_v55 = vmul.f32 %v962_v51, %v340_v52  ;;  %v432_v56 = vmul.f32 %v962_v51, %v380_v54 }
  0xfb   : > { %v342_v57 = vpop.f32.mrf.mxu0  ;;  %v382_v58 = vpop.f32.mrf.mxu1 }
  0xfc   : > { %v445_v59 = vadd.f32 %v967_v53, %v424_v55  ;;  %v453_v60 = vadd.f32 %v967_v53, %v432_v56 }
  0xfd   : > { %v345_v61 = vpop.f32.mrf.mxu0  ;;  %v385_v62 = vpop.f32.mrf.mxu1 }
  0xfe   : > { %v461_v63 = vmax.f32 %v445_v59, 0.0  ;;  %v469_v0 = vmax.f32 %v453_v60, 0.0  ;;  %v425_v1 = vmul.f32 %v962_v51, %v345_v61  ;;  %v433_v2 = vmul.f32 %v962_v51, %v385_v62 }
  0xff   : > { %v347_v3 = vpop.f32.mrf.mxu0  ;;  %v387_v4 = vpop.f32.mrf.mxu1 }
 0x100   : > { %477 = vst [vmem:[%s977_s8] sm:$0xff] %v461_v63  ;;  %485 = vst [vmem:[%s977_s8 + $0x40] sm:$0xff] %v469_v0  ;;  %v446_v5 = vadd.f32 %v967_v53, %v425_v1  ;;  %v454_v6 = vadd.f32 %v967_v53, %v433_v2 }
 0x101   : > { %v350_v7 = vpop.f32.mrf.mxu0  ;;  %v390_v8 = vpop.f32.mrf.mxu1 }
 0x102   : > { %v462_v9 = vmax.f32 %v446_v5, 0.0  ;;  %v470_v10 = vmax.f32 %v454_v6, 0.0  ;;  %v426_v11 = vmul.f32 %v962_v51, %v350_v7  ;;  %v434_v12 = vmul.f32 %v962_v51, %v390_v8 }
 0x103   : > { %v352_v13 = vpop.f32.mrf.mxu0  ;;  %v392_v14 = vpop.f32.mrf.mxu1 }
 0x104   : > { %478 = vst [vmem:[%s977_s8 + $0x8] sm:$0xff] %v462_v9  ;;  %486 = vst [vmem:[%s977_s8 + $0x48] sm:$0xff] %v470_v10  ;;  %v447_v15 = vadd.f32 %v967_v53, %v426_v11  ;;  %v455_v16 = vadd.f32 %v967_v53, %v434_v12 }
 0x105   : > { %v355_v17 = vpop.f32.mrf.mxu0  ;;  %v395_v18 = vpop.f32.mrf.mxu1 }
 0x106   : > { %v463_v19 = vmax.f32 %v447_v15, 0.0  ;;  %v471_v20 = vmax.f32 %v455_v16, 0.0  ;;  %v427_v21 = vmul.f32 %v962_v51, %v355_v17  ;;  %v435_v22 = vmul.f32 %v962_v51, %v395_v18 }
 0x107   : > { %v357_v23 = vpop.f32.mrf.mxu0  ;;  %v397_v24 = vpop.f32.mrf.mxu1 }
 0x108   : > { %479 = vst [vmem:[%s977_s8 + $0x10] sm:$0xff] %v463_v19  ;;  %487 = vst [vmem:[%s977_s8 + $0x50] sm:$0xff] %v471_v20  ;;  %v448_v25 = vadd.f32 %v967_v53, %v427_v21  ;;  %v456_v26 = vadd.f32 %v967_v53, %v435_v22 }
 0x109   : > { %v360_v27 = vpop.f32.mrf.mxu0  ;;  %v400_v28 = vpop.f32.mrf.mxu1 }
 0x10a   : > { %v464_v29 = vmax.f32 %v448_v25, 0.0  ;;  %v472_v30 = vmax.f32 %v456_v26, 0.0  ;;  %v428_v31 = vmul.f32 %v962_v51, %v360_v27  ;;  %v436_v32 = vmul.f32 %v962_v51, %v400_v28 }
 0x10b   : > { %v362_v33 = vpop.f32.mrf.mxu0  ;;  %v402_v34 = vpop.f32.mrf.mxu1 }
 0x10c   : > { %480 = vst [vmem:[%s977_s8 + $0x18] sm:$0xff] %v464_v29  ;;  %488 = vst [vmem:[%s977_s8 + $0x58] sm:$0xff] %v472_v30  ;;  %v449_v35 = vadd.f32 %v967_v53, %v428_v31  ;;  %v457_v36 = vadd.f32 %v967_v53, %v436_v32 }
 0x10d   : > { %v365_v37 = vpop.f32.mrf.mxu0  ;;  %v405_v38 = vpop.f32.mrf.mxu1 }
 0x10e   : > { %v465_v39 = vmax.f32 %v449_v35, 0.0  ;;  %v473_v40 = vmax.f32 %v457_v36, 0.0  ;;  %v429_v41 = vmul.f32 %v962_v51, %v365_v37  ;;  %v437_v42 = vmul.f32 %v962_v51, %v405_v38 }
 0x10f   : > { %v367_v43 = vpop.f32.mrf.mxu0  ;;  %v407_v44 = vpop.f32.mrf.mxu1 }
 0x110   : > { %481 = vst [vmem:[%s977_s8 + $0x20] sm:$0xff] %v465_v39  ;;  %489 = vst [vmem:[%s977_s8 + $0x60] sm:$0xff] %v473_v40  ;;  %v450_v45 = vadd.f32 %v967_v53, %v429_v41  ;;  %v458_v46 = vadd.f32 %v967_v53, %v437_v42 }
 0x111   : > { %v370_v47 = vpop.f32.mrf.mxu0  ;;  %v410_v48 = vpop.f32.mrf.mxu1 }
 0x112   : > { %v466_v49 = vmax.f32 %v450_v45, 0.0  ;;  %v474_v50 = vmax.f32 %v458_v46, 0.0  ;;  %v430_v52 = vmul.f32 %v962_v51, %v370_v47  ;;  %v438_v54 = vmul.f32 %v962_v51, %v410_v48 }
 0x113   : > { %v372_v55 = vpop.f32.mrf.mxu0  ;;  %v412_v56 = vpop.f32.mrf.mxu1 }
 0x114   : > { %482 = vst [vmem:[%s977_s8 + $0x28] sm:$0xff] %v466_v49  ;;  %490 = vst [vmem:[%s977_s8 + $0x68] sm:$0xff] %v474_v50  ;;  %v451_v57 = vadd.f32 %v967_v53, %v430_v52  ;;  %v459_v58 = vadd.f32 %v967_v53, %v438_v54 }
 0x115   : > { %v375_v59 = vpop.f32.mrf.mxu0  ;;  %v415_v60 = vpop.f32.mrf.mxu1 }
 0x116   : > { %v467_v61 = vmax.f32 %v451_v57, 0.0  ;;  %v475_v62 = vmax.f32 %v459_v58, 0.0  ;;  %v431_v63 = vmul.f32 %v962_v51, %v375_v59  ;;  %v439_v0 = vmul.f32 %v962_v51, %v415_v60 }
 0x117   : > { %v377_v1 = vpop.f32.mrf.mxu0  ;;  %v417_v2 = vpop.f32.mrf.mxu1 }
 0x118   : > { %483 = vst [vmem:[%s977_s8 + $0x30] sm:$0xff] %v467_v61  ;;  %491 = vst [vmem:[%s977_s8 + $0x70] sm:$0xff] %v475_v62  ;;  %v452_v3 = vadd.f32 %v967_v53, %v431_v63  ;;  %v460_v4 = vadd.f32 %v967_v53, %v439_v0 }
 0x11a   : > { %v468_v51 = vmax.f32 %v452_v3, 0.0  ;;  %v476_v5 = vmax.f32 %v460_v4, 0.0 }
 0x11c   : > { %484 = vst [vmem:[%s977_s8 + $0x38] sm:$0xff] %v468_v51  ;;  %492 = vst [vmem:[%s977_s8 + $0x78] sm:$0xff] %v476_v5 }
 0x11d   : > { %693 = shalt.err (!%p690_p3)
}
 0x11e   : > { %s694_s27 = scalar_lea.hbm %s1024_s19, 2048  ;;  %s698_s30 = scalar_lea.hbm %s1075_s3, 4096 }
 0x11f   : > { %p695_p4 = scmp.ne.s32.totalorder %s1024_s19, %s694_s27  ;;  %p699_p9 = scmp.lt.s32.totalorder %s1024_s19, %s1075_s3 }
 0x120   : > { %p700_p10 = scmp.lt.s32.totalorder %s698_s30, %s694_s27 }
 0x121   : > { %p696_p7 = pnand %p695_p4, %p804_p5 }
 0x122   : > { %p701_p11 = por %p700_p10, %p699_p9 }
 0x123   : > { %p697_p8 = pneg %p696_p7 }
 0x125   : > { %p702_p12 = pnand %p701_p11, %p697_p8 }
 0x127   : > { %705 = shalt.err (!%p702_p12)
}
 0x128   : > { %s744_s6 = smov 128   ;;  %s745_s7 = smov 8  }
 0x129   : > { %638 = dma.vmem_to_hbm [thread:$0]  (%p804_p5), %s1026_s10, 2048, %s1024_s19, %s1032_s16, %s744_s6, %s744_s6, %s745_s7  }
 0x12a PF: > { %p644_p13 = scmp.ge.s32.totalorder %s740_s15, 2  ;;  %s522_s8 = sand.u32 1, %s728_s12  }
 0x12b   : > { %s523_s9 = scalar_lea.sflag [#allocation3], %s522_s8 }
 0x12c   : > { %p641_p0 = pnand %p644_p13, %p808_p6 }
 0x12e   : > { %p642_p1 = pneg %p641_p0 }
 0x130   : > { %723 = dma.done.wait (%p642_p1), %s523_s9, 2048  }
 0x131   : > { %725 = vsyncadd (%p642_p1), %s523_s9, 4294965248  ;;  %p13_p2 = scmp.ge.s32.totalorder %s791_s18, 4   ;;  %s1078_s12 = smov %s732_s13 }
 0x132   : > { %s1079_s13 = smov %s736_s14  ;;  %s1080_s14 = smov %s802_s21 }
 0x133   : > { %s1081_s15 = smov %s791_s18  ;;  %15 = sbr.rel (!%p13_p2) target bundleno = 3 (0x3), region = 67 }
 0x138   :  { %528 = vsyncpa [#allocation3], 1 }
 0x139   :  { %530 = vsyncpa [#allocation3 + $0x1], 1 }

</bundles_post_ra>
